<compile_context>
chip_gen: v6e
topology: v6e:2x2x1
jax: 0.10.0
libtpu: 0.0.40
codegen_flags: <defaults>
</compile_context>

<pallas_src>
import jax
import jax.numpy as jnp
from jax.experimental import pallas as pl
from jax.experimental.pallas import tpu as pltpu


def _edge_embed_kernel(x_ref, w1_ref, b1_ref, w2_ref, b2_ref, o_ref):
    """One (tile_rows, D) slab. w* are (D, D) f32 (BN folded); b* are (1, D) f32."""
    h = jnp.dot(x_ref[...], w1_ref[...], preferred_element_type=jnp.float32)
    h = h + b1_ref[...]
    h = jnp.where(h > 0, h, 0.1 * h)          # LeakyReLU(0.1)

    h = jnp.dot(h, w2_ref[...], preferred_element_type=jnp.float32)
    h = h + b2_ref[...]
    h = jnp.where(h > 0, h, 0.1 * h)

    o_ref[...] = h.astype(o_ref.dtype)


def _clamp_tile(tile, n_view_rows):
    """Tile rows: multiple of 8 (or the full extent for tiny inputs)."""
    if n_view_rows <= 8:
        return int(n_view_rows)
    cap = (n_view_rows // 8) * 8
    tile = max(8, min(int(tile), cap))
    return (tile // 8) * 8


def _auto_tile(n_view_rows, row_bytes, target_bytes=4 << 20, min_steps=8):
    t = max(8, target_bytes // max(row_bytes, 1))
    # Prefer enough grid steps for megacore + steady-state pipelining over huge tiles.
    while t > 8 and -(-n_view_rows // t) < min_steps:
        t //= 2
    t = max(8, (t // 8) * 8)
    return _clamp_tile(t, n_view_rows)


def edge_feature_embedding(x, params, *, tile_rows=None, bn_eps=1e-5):
    """x: (..., n_edge_features). params: PyTorch-layout weights + BN running stats.

    Mirrors EdgeFeatureEmbeddingLayer's embed DNN in eval mode (dropout=0, BN running stats).
    `tile_rows` (optional) is the number of rows of the kernel's 2-D view per grid step
    (grouped rows when the lane-dense G-row grouping is active).
    """
    orig_shape = x.shape
    nef = int(orig_shape[-1])
    n_rows = 1
    for d in orig_shape[:-1]:
        n_rows *= int(d)
    itemsize = int(jnp.dtype(x.dtype).itemsize)

    # ---- fold BatchNorm (running stats) into the Linear weights / biases, f32 once ----
    def fold(w, b, gamma, beta, mean, var):
        w = jnp.asarray(w, jnp.float32).T                       # (out,in) -> (in,out)
        b = jnp.asarray(b, jnp.float32)
        s = jnp.asarray(gamma, jnp.float32) * jax.lax.rsqrt(
            jnp.asarray(var, jnp.float32) + bn_eps)
        t = jnp.asarray(beta, jnp.float32) - jnp.asarray(mean, jnp.float32) * s
        return w * s[None, :], b * s + t

    w1, b1 = fold(params["w1"], params["b1"], params["gamma1"], params["beta1"],
                  params["mean1"], params["var1"])
    w2, b2 = fold(params["w2"], params["b2"], params["gamma2"], params["beta2"],
                  params["mean2"], params["var2"])

    # ---- lane-dense grouping: pack G = 128 // nef rows per 128-lane row (free reshape) ----
    G = 128 // nef if (nef < 128 and 128 % nef == 0) else 1
    if G > 1 and n_rows % G == 0:
        D = G * nef
        n_view = n_rows // G
        x_view = x.reshape(n_view, D)                           # contiguous -> bitcast, free
        eye = jnp.eye(G, dtype=jnp.float32)
        w1k, w2k = jnp.kron(eye, w1), jnp.kron(eye, w2)         # block-diagonal (D, D)
        b1k, b2k = jnp.tile(b1, G).reshape(1, D), jnp.tile(b2, G).reshape(1, D)
    else:
        # TODO(synk): when n_rows % (128 // nef) != 0 we keep the lane-sparse layout rather
        #             than pay a pad + slice HBM round trip (kernel is HBM-bound).
        D = nef
        n_view = n_rows
        x_view = x.reshape(n_view, D)
        w1k, w2k = w1, w2
        b1k, b2k = b1.reshape(1, D), b2.reshape(1, D)

    # ---- row tiling over the fused rows axis; ragged last block handled by Pallas ----
    row_bytes = D * itemsize
    if tile_rows is None:
        tr = _auto_tile(n_view, row_bytes)
    else:
        tr = _clamp_tile(tile_rows, n_view)
    grid = (pl.cdiv(n_view, tr),)

    row_spec = pl.BlockSpec((tr, D), lambda i: (i, 0))
    mat_spec = pl.BlockSpec((D, D), lambda i: (0, 0))           # VMEM-resident params
    vec_spec = pl.BlockSpec((1, D), lambda i: (0, 0))

    # ---- VMEM budget: double-buffered in/out tiles + f32 intermediates + params ----
    tile_io = tr * D * itemsize
    tile_f32 = tr * D * 4
    param_b = 2 * (D * D + D) * 4
    vmem_limit = int(min(56 << 20,
                         max(32 << 20, 4 * tile_io + 4 * tile_f32 + 4 * param_b + (8 << 20))))

    cost = pl.CostEstimate(
        flops=int(n_rows * (4 * nef * nef + 6 * nef)),
        transcendentals=0,
        bytes_accessed=int(2 * n_rows * nef * itemsize + 2 * (nef * nef + nef) * 4),
    )

    out = pl.pallas_call(
        _edge_embed_kernel,
        out_shape=jax.ShapeDtypeStruct((n_view, D), x.dtype),
        grid_spec=pltpu.PrefetchScalarGridSpec(
            num_scalar_prefetch=0,
            grid=grid,
            in_specs=[row_spec, mat_spec, vec_spec, mat_spec, vec_spec],
            out_specs=row_spec,
        ),
        compiler_params=pltpu.CompilerParams(
            dimension_semantics=("parallel",),
            vmem_limit_bytes=vmem_limit,
        ),
        cost_estimate=cost,
    )(x_view, w1k, b1k, w2k, b2k)

    return out.reshape(orig_shape[:-1] + (nef,))


def _reference(x, params, bn_eps=1e-5):
    """Pure-JAX reference of the eval-mode DNN (Linear -> BN -> LeakyReLU(0.1)) x2."""
    def layer(h, w, b, g, bt, m, v):
        h = h @ jnp.asarray(w, jnp.float32).T + jnp.asarray(b, jnp.float32)
        h = (h - jnp.asarray(m, jnp.float32)) / jnp.sqrt(jnp.asarray(v, jnp.float32) + bn_eps)
        h = h * jnp.asarray(g, jnp.float32) + jnp.asarray(bt, jnp.float32)
        return jnp.where(h > 0, h, 0.1 * h)

    h = jnp.asarray(x, jnp.float32)
    h = layer(h, params["w1"], params["b1"], params["gamma1"], params["beta1"],
              params["mean1"], params["var1"])
    h = layer(h, params["w2"], params["b2"], params["gamma2"], params["beta2"],
              params["mean2"], params["var2"])
    return h.astype(x.dtype)


if __name__ == "__main__":
    key = jax.random.PRNGKey(0)
    n_edges, nef = 200, 32            # nef = n_edge_features; 200 % (128//32) == 0
    ks = jax.random.split(key, 14)

    x = jax.random.normal(ks[0], (n_edges, nef), dtype=jnp.float32)
    params = {
        "w1":     0.1 * jax.random.normal(ks[1], (nef, nef), jnp.float32),
        "b1":     0.1 * jax.random.normal(ks[2], (nef,), jnp.float32),
        "gamma1": 1.0 + 0.1 * jax.random.normal(ks[3], (nef,), jnp.float32),
        "beta1":  0.1 * jax.random.normal(ks[4], (nef,), jnp.float32),
        "mean1":  0.1 * jax.random.normal(ks[5], (nef,), jnp.float32),
        "var1":   jnp.abs(jax.random.normal(ks[6], (nef,), jnp.float32)) + 0.5,
        "w2":     0.1 * jax.random.normal(ks[7], (nef, nef), jnp.float32),
        "b2":     0.1 * jax.random.normal(ks[8], (nef,), jnp.float32),
        "gamma2": 1.0 + 0.1 * jax.random.normal(ks[9], (nef,), jnp.float32),
        "beta2":  0.1 * jax.random.normal(ks[10], (nef,), jnp.float32),
        "mean2":  0.1 * jax.random.normal(ks[11], (nef,), jnp.float32),
        "var2":   jnp.abs(jax.random.normal(ks[12], (nef,), jnp.float32)) + 0.5,
    }

    # Lane-dense grouped path (G=4, grouped view 50x128), tile_rows=16 -> 4 grid steps
    # with a ragged last block (no pad, no slice).
    out = jax.block_until_ready(edge_feature_embedding(x, params, tile_rows=16))
    ref = _reference(x, params)
    assert out.shape == ref.shape, (out.shape, ref.shape)
    assert jnp.allclose(out, ref, atol=1e-4, rtol=1e-4), "mismatch vs reference (grouped)"

    # Non-divisible row count -> lane-sparse fallback with ragged last block (still no pad).
    x_odd = jax.random.normal(ks[13], (203, nef), dtype=jnp.float32)
    out_odd = jax.block_until_ready(edge_feature_embedding(x_odd, params))
    ref_odd = _reference(x_odd, params)
    assert jnp.allclose(out_odd, ref_odd, atol=1e-4, rtol=1e-4), "mismatch (fallback path)"

    # 3-D input (leading dims fused), auto tiling.
    x3 = x.reshape(4, 50, nef)
    out3 = jax.block_until_ready(edge_feature_embedding(x3, params))
    assert out3.shape == (4, 50, nef)
    assert jnp.allclose(out3.reshape(-1, nef), ref, atol=1e-4, rtol=1e-4), "mismatch (3D path)"

    print("KERNEL_OK")
</pallas_src>

<mosaic_0001>
module attributes {stable_mosaic.version = 11 : i64} {
  func.func @_edge_embed_kernel(%arg0: i32, %arg1: memref<16x128xf32, #tpu.memory_space<vmem>>, %arg2: memref<128x128xf32, #tpu.memory_space<vmem>>, %arg3: memref<1x128xf32, #tpu.memory_space<vmem>>, %arg4: memref<128x128xf32, #tpu.memory_space<vmem>>, %arg5: memref<1x128xf32, #tpu.memory_space<vmem>>, %arg6: memref<16x128xf32, #tpu.memory_space<vmem>>) attributes {dimension_semantics = [#tpu.dimension_semantics<parallel>], iteration_bounds = array<i64: 4>, scalar_prefetch = 0 : i64, scratch_operands = 0 : i64, tpu.core_type = #tpu.core_type<tc>, window_params = [{transform_indices = @transform_0, window_bounds = array<i64: 16, 128>}, {pipeline_mode = #tpu.pipeline_mode<synchronous>, transform_indices = @transform_1, window_bounds = array<i64: 128, 128>}, {pipeline_mode = #tpu.pipeline_mode<synchronous>, transform_indices = @transform_2, window_bounds = array<i64: 1, 128>}, {pipeline_mode = #tpu.pipeline_mode<synchronous>, transform_indices = @transform_3, window_bounds = array<i64: 128, 128>}, {pipeline_mode = #tpu.pipeline_mode<synchronous>, transform_indices = @transform_4, window_bounds = array<i64: 1, 128>}, {transform_indices = @transform_5, window_bounds = array<i64: 16, 128>}]} {
    %c0 = arith.constant 0 : index
    %c0_0 = arith.constant 0 : index
    %0 = vector.load %arg1[%c0, %c0_0] : memref<16x128xf32, #tpu.memory_space<vmem>>, vector<16x128xf32>
    %c0_1 = arith.constant 0 : index
    %c0_2 = arith.constant 0 : index
    %1 = vector.load %arg2[%c0_1, %c0_2] : memref<128x128xf32, #tpu.memory_space<vmem>>, vector<128x128xf32>
    %cst = arith.constant dense<0.000000e+00> : vector<16x128xf32>
    %2 = tpu.matmul %0, %1, %cst {dimension_numbers = #tpu.dot_dimension_numbers<[1], [0], [0], [1], [0, 0, 1, 1], [], []>} : vector<16x128xf32>, vector<128x128xf32>, vector<16x128xf32> -> vector<16x128xf32>
    %c0_3 = arith.constant 0 : index
    %c0_4 = arith.constant 0 : index
    %3 = vector.load %arg3[%c0_3, %c0_4] : memref<1x128xf32, #tpu.memory_space<vmem>>, vector<1x128xf32>
    %4 = vector.broadcast %3 : vector<1x128xf32> to vector<16x128xf32>
    %5 = arith.addf %2, %4 : vector<16x128xf32>
    %cst_5 = arith.constant 0.000000e+00 : f32
    %6 = vector.broadcast %cst_5 : f32 to vector<16x128xf32>
    %7 = arith.cmpf ogt, %5, %6 : vector<16x128xf32>
    %cst_6 = arith.constant 1.000000e-01 : f32
    %8 = vector.broadcast %cst_6 : f32 to vector<16x128xf32>
    %9 = arith.mulf %8, %5 : vector<16x128xf32>
    %10 = arith.select %7, %5, %9 : vector<16x128xi1>, vector<16x128xf32>
    %c0_7 = arith.constant 0 : index
    %c0_8 = arith.constant 0 : index
    %11 = vector.load %arg4[%c0_7, %c0_8] : memref<128x128xf32, #tpu.memory_space<vmem>>, vector<128x128xf32>
    %cst_9 = arith.constant dense<0.000000e+00> : vector<16x128xf32>
    %12 = tpu.matmul %10, %11, %cst_9 {dimension_numbers = #tpu.dot_dimension_numbers<[1], [0], [0], [1], [0, 0, 1, 1], [], []>} : vector<16x128xf32>, vector<128x128xf32>, vector<16x128xf32> -> vector<16x128xf32>
    %c0_10 = arith.constant 0 : index
    %c0_11 = arith.constant 0 : index
    %13 = vector.load %arg5[%c0_10, %c0_11] : memref<1x128xf32, #tpu.memory_space<vmem>>, vector<1x128xf32>
    %14 = vector.broadcast %13 : vector<1x128xf32> to vector<16x128xf32>
    %15 = arith.addf %12, %14 : vector<16x128xf32>
    %cst_12 = arith.constant 0.000000e+00 : f32
    %16 = vector.broadcast %cst_12 : f32 to vector<16x128xf32>
    %17 = arith.cmpf ogt, %15, %16 : vector<16x128xf32>
    %cst_13 = arith.constant 1.000000e-01 : f32
    %18 = vector.broadcast %cst_13 : f32 to vector<16x128xf32>
    %19 = arith.mulf %18, %15 : vector<16x128xf32>
    %20 = arith.select %17, %15, %19 : vector<16x128xi1>, vector<16x128xf32>
    %c0_14 = arith.constant 0 : index
    %c0_15 = arith.constant 0 : index
    %21 = vector.load %arg6[%c0_14, %c0_15] : memref<16x128xf32, #tpu.memory_space<vmem>>, vector<16x128xf32>
    tpu.vector_store %arg6[%c0_14, %c0_15], %20 {strides = array<i32>} : memref<16x128xf32, #tpu.memory_space<vmem>>, vector<16x128xf32>,
    return
  }
  func.func @transform_0(%arg0: i32) -> (i32, i32) {
    %c0_i32 = arith.constant 0 : i32
    %c0_i32_0 = arith.constant 0 : i32
    return %arg0, %c0_i32 : i32, i32
  }
  func.func @transform_1(%arg0: i32) -> (i32, i32) {
    %c0_i32 = arith.constant 0 : i32
    %c0_i32_0 = arith.constant 0 : i32
    %c0_i32_1 = arith.constant 0 : i32
    return %c0_i32, %c0_i32_0 : i32, i32
  }
  func.func @transform_2(%arg0: i32) -> (i32, i32) {
    %c0_i32 = arith.constant 0 : i32
    %c0_i32_0 = arith.constant 0 : i32
    %c0_i32_1 = arith.constant 0 : i32
    return %c0_i32, %c0_i32_0 : i32, i32
  }
  func.func @transform_3(%arg0: i32) -> (i32, i32) {
    %c0_i32 = arith.constant 0 : i32
    %c0_i32_0 = arith.constant 0 : i32
    %c0_i32_1 = arith.constant 0 : i32
    return %c0_i32, %c0_i32_0 : i32, i32
  }
  func.func @transform_4(%arg0: i32) -> (i32, i32) {
    %c0_i32 = arith.constant 0 : i32
    %c0_i32_0 = arith.constant 0 : i32
    %c0_i32_1 = arith.constant 0 : i32
    return %c0_i32, %c0_i32_0 : i32, i32
  }
  func.func @transform_5(%arg0: i32) -> (i32, i32) {
    %c0_i32 = arith.constant 0 : i32
    %c0_i32_0 = arith.constant 0 : i32
    return %arg0, %c0_i32 : i32, i32
  }
}

</mosaic_0001>

<bundles_post_ra>
// kernel: tpu_custom_call.1
= control target key start
LH: loop header
LB: loop body
LE: loop exit
PB: predicated region body
PF: predicated region fallthrough
CT: control target
= control target key end

     0   :  { %10 = vsyncpa [#allocation3], 0  ;;  %s1225_s0 = inlined_call_operand.hbm [shape: f32[50,128], index: 0, kind: input, shape index: {}]   ;;  %s1226_s1 = inlined_call_operand.hbm [shape: f32[128,128], index: 1, kind: input, shape index: {}]   ;;  %s1227_s2 = inlined_call_operand.vmem [shape: f32[1,128], index: 2, kind: input, shape index: {}]   ;;  %s1228_s3 = inlined_call_operand.hbm [shape: f32[128,128], index: 3, kind: input, shape index: {}]   ;;  %s1229_s4 = inlined_call_operand.vmem [shape: f32[1,128], index: 4, kind: input, shape index: {}]   ;;  %s1230_s5 = inlined_call_operand.hbm [shape: f32[50,128], index: 5, kind: output, shape index: {}]  }
   0x1   :  { %12 = vsyncpa [#allocation3 + $0x1], 0 }
   0x2   :  { %13 = vsyncpa [#allocation6], 0 }
   0x3   :  { %14 = vsyncpa [#allocation4], 0 }
   0x4   :  { %16 = vsyncpa [#allocation4 + $0x1], 0  ;;  %s1002_s18 = smov 0   ;;  %s1004_s19 = smov 0  }
   0x5   :  { %s1006_s20 = smov 0   ;;  %s1008_s21 = smov 0  }
   0x6 LB: > { %s1023_s22 = sadd.s32 4294967295, %s960_s21   ;;  %s612_s23 = sadd.s32 4294967294, %s960_s21   ;;  %s960_s21 = sphi %s1008_s21, %s1247_s21   ;;  %s956_s20 = sphi %s1006_s20, %s1246_s20   ;;  %s952_s19 = sphi %s1004_s19, %s1245_s19   ;;  %s948_s18 = sphi %s1002_s18, %s1244_s18  }
   0x7   : > { %s1027_s24 = sadd.s32 1, %s960_s21   ;;  %s29_s25 = sadd.s32 1, %s956_s20 }
   0x8   : > { %s26_s26 = ssub.s32 %s960_s21, %s1027_s24  ;;  %p36_p0 = scmp.ne.s32.totalorder %s956_s20, %s952_s19 }
   0x9   : > { %p27_p1 = scmp.eq.s32.totalorder %s26_s26, 0  ;;  %p37_p2 = scmp.eq.s32.totalorder %s960_s21, 0 }
   0xa   : > { %p42_p3 = scmp.ne.s32.totalorder %s952_s19, %s948_s18  ;;  %p1231_p4 = scmp.eq.s32.totalorder %s1023_s22, 0 }
   0xb   : > { %s1039_s27 = scalar_select %p27_p1, %s956_s20, %s29_s25  }
   0xc   : > { %p1041_p5 = por %p37_p2, %p36_p0  ;;  %p1047_p6 = por %p1231_p4, %p42_p3 }
   0xd   : > { %p150_p7 = scmp.eq.s32.totalorder %s1023_s22, 3  ;;  %p156_p8 = scmp.eq.s32.totalorder %s612_s23, 3 }
   0xe   : > { %s1234_s29 = scalar_select %p1047_p6, 1, 0 }
   0xf   : > { %p613_p9 = scmp.ge.s32.totalorder %s960_s21, 1  ;;  %p163_p10 = scmp.lt.s32.totalorder %s960_s21, 5 }
  0x10   : > { %p1054_p11 = por %p150_p7, %p36_p0  ;;  %p1058_p12 = por %p156_p8, %p42_p3 }
  0x11   : > { %p1062_p13 = pnand %p613_p9, %p163_p10  ;;  %s962_s8 = smov [#allocation5]  }
  0x12   : > { %s1235_s30 = scalar_select %p1054_p11, 1, 0 }
  0x13   : > { %s1236_s6 = scalar_select %p1058_p12, 1, 0 }
  0x14   : > { %p758_p1 = pneg %p1062_p13  ;;  %s175_s9 = sshll.u32 %s962_s8, 4  ;;  %s176_s9 = int_to_ptr.vmem [resolvable:$true] %s175_s9 }
  0x15   : > { %s963_s11 = smov [#allocation7]   ;;  %s825_s13 = scalar_lea.vmem %s176_s9, 2048 }
  0x16   : > { %p1070_p2 = pnand %p758_p1, %p1231_p4  ;;  %s191_s12 = sshll.u32 %s963_s11, 4  ;;  %s192_s12 = int_to_ptr.vmem [resolvable:$true] %s191_s12 }
  0x17   : > { %p826_p3 = scmp.ne.s32.totalorder %s176_s9, %s825_s13  ;;  %p833_p9 = scmp.lt.s32.totalorder %s176_s9, %s176_s9 }
  0x18   : > { %p816_p0 = pneg %p1070_p2  ;;  %p834_p10 = scmp.lt.s32.totalorder %s825_s13, %s825_s13 }
  0x1a   : > { %p828_p7 = pnand %p826_p3, %p816_p0  ;;  %p835_p12 = por %p834_p10, %p833_p9 }
  0x1c   : > { %p829_p8 = pneg %p828_p7 }
  0x1e   : > { %p836_p1 = pnand %p835_p12, %p829_p8 }
  0x20   : > { %839 = shalt.err (!%p836_p1)
}
  0x21   : > { %s964_s14 = smov 128   ;;  %s965_s15 = smov 8  }
  0x22   : > { %761 = dma.hbm_to_vmem [thread:$0]  (!%p1070_p2), %s1226_s1, 2048, %s176_s9, [#allocation6], %s964_s14, %s964_s14, %s965_s15  }
  0x23   : > { %s851_s23 = scalar_lea.vmem %s192_s12, 2048  ;;  %p859_p11 = scmp.lt.s32.totalorder %s192_s12, %s192_s12 }
  0x24   : > { %p852_p4 = scmp.ne.s32.totalorder %s192_s12, %s851_s23  ;;  %p860_p6 = scmp.lt.s32.totalorder %s851_s23, %s851_s23 }
  0x26   : > { %p854_p3 = pnand %p852_p4, %p816_p0  ;;  %p861_p9 = por %p860_p6, %p859_p11 }
  0x28   : > { %p855_p7 = pneg %p854_p3 }
  0x2a   : > { %p862_p12 = pnand %p861_p9, %p855_p7 }
  0x2c   : > { %865 = shalt.err (!%p862_p12)
}
  0x2d   : > { %764 = dma.hbm_to_vmem [thread:$0]  (!%p1070_p2), %s1228_s3, 2048, %s192_s12, [#allocation6], %s964_s14, %s964_s14, %s965_s15  }
  0x2e   : > { %p616_p8 = scmp.ge.s32.totalorder %s960_s21, 4 }
  0x30   : > { %204 = sbr.rel (%p616_p8) target bundleno = 85 (0x55), region = 32 }
  0x35   : > { %207 = sbr.rel (!%p1041_p5) target bundleno = 85 (0x55), region = 36  ;;  %s208_s8 = sand.u32 (%p1041_p5), 1, %s956_s20  }
  0x36   : > { %s618_s9 = sshll.u32 (%p1041_p5), %s960_s21, 1  ;;  %s617_s11 = sshll.u32 (%p1041_p5), %s208_s8, 4 }
  0x37   : > { %s214_s13 = ssub.s32 (%p1041_p5), 7, %s618_s9  ;;  %s1100_s17 = scalar_lea.sflag (%p1041_p5), [#allocation3], %s208_s8 }
  0x38   : > { %p215_p4 = scmp.lt.s32.totalorder (%p1041_p5), %s214_s13, 2  ;;  %s212_s12 = scalar_lea.vmem (%p1041_p5), [#allocation2], %s617_s11 }
  0x3a   : > { %s1249_s13 = smov (!%p215_p4, %s214_s13), 2 }
  0x3b   : > { %s1097_s16 = sshll.u32 %s1249_s13, 7 }
  0x3c   : > { %s219_s10 = ssub.s32 256, %s1097_s16 }
  0x3d   : > { %220 = vsyncadd %s1100_s17, %s219_s10  ;;  %p620_p5 = scmp.ne.s32.totalorder %s1097_s16, 0  ;;  %s640_s28 = sshll.u32 %s960_s21, 8 }
  0x3e   : > { %s1108_s23 = scalar_lea.hbm %s1225_s0, %s640_s28  ;;  %s225_s25 = sshll.u32 %s212_s12, 4  ;;  %s1110_s25 = int_to_ptr.vmem [resolvable:$true] %s225_s25 }
  0x3f   : > { %s866_s26 = scalar_lea.hbm %s1108_s23, %s1097_s16  ;;  %s870_s11 = scalar_lea.hbm %s1225_s0, 896 }
  0x40   : > { %p867_p6 = scmp.ne.s32.totalorder %s1108_s23, %s866_s26  ;;  %p871_p0 = scmp.lt.s32.totalorder %s1108_s23, %s1225_s0 }
  0x41   : > { %p872_p10 = scmp.lt.s32.totalorder %s870_s11, %s866_s26 }
  0x42   : > { %p868_p11 = pnand %p867_p6, %p620_p5 }
  0x43   : > { %p873_p1 = por %p872_p10, %p871_p0 }
  0x44   : > { %p869_p2 = pneg %p868_p11 }
  0x46   : > { %p874_p3 = pnand %p873_p1, %p869_p2 }
  0x48   : > { %877 = shalt.err (!%p874_p3)
}
  0x49   : > { %s878_s12 = scalar_lea.vmem %s1110_s25, %s1097_s16  ;;  %s966_s28 = smov [#allocation2]  }
  0x4a   : > { %p879_p7 = scmp.ne.s32.totalorder %s1110_s25, %s878_s12  ;;  %s882_s14 = sshll.u32 %s966_s28, 4  ;;  %s883_s14 = int_to_ptr.vmem [resolvable:$false] %s882_s14 }
  0x4b   : > { %s884_s15 = scalar_lea.vmem %s883_s14, 512  ;;  %p885_p8 = scmp.lt.s32.totalorder %s1110_s25, %s883_s14 }
  0x4c   : > { %p880_p9 = pnand %p879_p7, %p620_p5  ;;  %p886_p4 = scmp.lt.s32.totalorder %s884_s15, %s878_s12 }
  0x4e   : > { %p881_p12 = pneg %p880_p9  ;;  %p887_p6 = por %p886_p4, %p885_p8 }
  0x50   : > { %p888_p11 = pnand %p887_p6, %p881_p12 }
  0x52   : > { %891 = shalt.err (!%p888_p11)
}
  0x53   : > { %s967_s26 = smov 128   ;;  %s968_s8 = smov 8  }
  0x54   : > { %231 = dma.hbm_to_vmem [thread:$0]  (%p620_p5), %s1108_s23, %s1097_s16, %s1110_s25, %s1100_s17, %s967_s26, %s967_s26, %s968_s8  }
  0x55 PF: > { %237 = sbr.rel (%p1062_p13) target bundleno = 556 (0x22c), region = 40  ;;  %s1139_s9 = sand.u32 (!%p1062_p13), 1, %s952_s19  }
  0x56   : > { %s625_s11 = sshll.u32 (!%p1062_p13), %s1139_s9, 4  ;;  %s240_s13 = scalar_lea.sflag (!%p1062_p13), [#allocation3], %s1139_s9 }
  0x57   : > { %s1145_s10 = scalar_lea.vmem (!%p1062_p13), [#allocation2], %s625_s11  ;;  %p1239_p2 = scmp.ne.s32.totalorder (!%p1062_p13), %s1234_s29, 0 }
  0x5a   : > { %935 = dma.done.wait (%p1239_p2), %s240_s13, 256  }
  0x5b   : > { %937 = vsyncadd (%p1239_p2), %s240_s13, 4294967040  ;;  %p1240_p5 = scmp.eq.s32.totalorder %s1023_s22, 0 }
  0x5d   : > { %939 = dma.done.wait (%p1240_p5), [#allocation6], 4096   ;;  %p1241_p13 = pmov %p1240_p5 }
  0x5e   : > { %v305_v0 = vld [vmem:[#allocation5 + $0x78] sm:$0xff]  ;;  %v304_v1 = vld [vmem:[#allocation5 + $0x70] sm:$0xff]  ;;  %v303_v2 = vld [vmem:[#allocation5 + $0x68] sm:$0xff]  ;;  %s277_s23 = scalar_lea.vmem [#allocation8], %s625_s11  ;;  %s501_s25 = scalar_lea.sflag [#allocation4], %s1139_s9 }
  0x5f   : > { %941 = vsyncadd (%p1241_p13), [#allocation6], 4294963200  ;;  %678 = vmatprep.subr.mxu0 %v305_v0  ;;  %v302_v3 = vld [vmem:[#allocation5 + $0x60] sm:$0xff]  ;;  %v301_v5 = vld [vmem:[#allocation5 + $0x58] sm:$0xff]  ;;  %p1242_p0 = scmp.ne.s32.totalorder %s1235_s30, 0 }
  0x60   : > { %679 = vmatpush3.msra.mxu0 %v305_v0  ;;  %v288_v4 = vld [vmem:[%s1145_s10] sm:$0xff]  ;;  %v409_v6 = vld [vmem:[#allocation7 + $0x78] sm:$0xff]  ;;  %v407_v9 = vld [vmem:[#allocation7 + $0x68] sm:$0xff]  ;;  %s632_s12 = sshll.u32 (%p1242_p0), %s1023_s22, 1 }
  0x61   : > { %680 = vmatprep.subr.mxu0 %v304_v1  ;;  %710 = vmatprep.mubr.f32.mxu0 %v288_v4  ;;  %v408_v7 = vld [vmem:[#allocation7 + $0x70] sm:$0xff]  ;;  %v299_v10 = vld [vmem:[#allocation5 + $0x48] sm:$0xff]  ;;  %v406_v11 = vld [vmem:[#allocation7 + $0x60] sm:$0xff]  ;;  %s509_s28 = ssub.s32 (%p1242_p0), 7, %s632_s12 }
  0x62   : > { %681 = vmatpush3.msra.mxu0 %v304_v1  ;;  %713 = vmatprep.subr.mxu1 %v409_v6  ;;  %v300_v8 = vld [vmem:[#allocation5 + $0x50] sm:$0xff]  ;;  %v298_v12 = vld [vmem:[#allocation5 + $0x40] sm:$0xff]  ;;  %v405_v13 = vld [vmem:[#allocation7 + $0x58] sm:$0xff]  ;;  %p510_p10 = scmp.lt.s32.totalorder (%p1242_p0), %s509_s28, 2 }
  0x63   : > { %682 = vmatprep.subr.mxu0 %v303_v2  ;;  %714 = vmatpush3.msra.mxu1 %v409_v6  ;;  %v297_v14 = vld [vmem:[#allocation5 + $0x38] sm:$0xff]  ;;  %v404_v15 = vld [vmem:[#allocation7 + $0x50] sm:$0xff]  ;;  %v403_v17 = vld [vmem:[#allocation7 + $0x48] sm:$0xff] }
  0x64   : > { %683 = vmatpush3.msra.mxu0 %v303_v2  ;;  %715 = vmatprep.subr.mxu1 %v408_v7  ;;  %v296_v16 = vld [vmem:[#allocation5 + $0x30] sm:$0xff]  ;;  %v295_v18 = vld [vmem:[#allocation5 + $0x28] sm:$0xff]  ;;  %v402_v19 = vld [vmem:[#allocation7 + $0x40] sm:$0xff] }
  0x65   : > { %684 = vmatprep.subr.mxu0 %v302_v3  ;;  %716 = vmatpush3.msra.mxu1 %v408_v7  ;;  %v294_v20 = vld [vmem:[#allocation5 + $0x20] sm:$0xff]  ;;  %v401_v21 = vld [vmem:[#allocation7 + $0x38] sm:$0xff]  ;;  %v400_v23 = vld [vmem:[#allocation7 + $0x30] sm:$0xff] }
  0x66   : > { %685 = vmatpush3.msra.mxu0 %v302_v3  ;;  %717 = vmatprep.subr.mxu1 %v407_v9  ;;  %v293_v22 = vld [vmem:[#allocation5 + $0x18] sm:$0xff]  ;;  %v292_v24 = vld [vmem:[#allocation5 + $0x10] sm:$0xff]  ;;  %v399_v25 = vld [vmem:[#allocation7 + $0x28] sm:$0xff] }
  0x67   : > { %686 = vmatprep.subr.mxu0 %v301_v5  ;;  %718 = vmatpush3.msra.mxu1 %v407_v9  ;;  %v291_v26 = vld [vmem:[#allocation5 + $0x8] sm:$0xff]  ;;  %v398_v27 = vld [vmem:[#allocation7 + $0x20] sm:$0xff]  ;;  %v397_v30 = vld [vmem:[#allocation7 + $0x18] sm:$0xff] }
  0x68   : > { %687 = vmatpush3.msra.mxu0 %v301_v5  ;;  %719 = vmatprep.subr.mxu1 %v406_v11  ;;  %v290_v28 = vld [vmem:[#allocation5] sm:$0xff]  ;;  %v289_v29 = vld [vmem:[%s1145_s10 + $0x8] sm:$0xff]  ;;  %v396_v31 = vld [vmem:[#allocation7 + $0x10] sm:$0xff] }
  0x69   : > { %688 = vmatprep.subr.mxu0 %v300_v8  ;;  %720 = vmatpush3.msra.mxu1 %v406_v11  ;;  %v395_v32 = vld [vmem:[#allocation7 + $0x8] sm:$0xff]  ;;  %v394_v33 = vld [vmem:[#allocation7] sm:$0xff] }
  0x6a   : > { %689 = vmatpush3.msra.mxu0 %v300_v8  ;;  %721 = vmatprep.subr.mxu1 %v405_v13  ;;  %v629_v34 = vld [vmem:[%s1227_s2] ss:$0 sm:$0xff] }
  0x6b   : > { %690 = vmatprep.subr.mxu0 %v299_v10  ;;  %722 = vmatpush3.msra.mxu1 %v405_v13  ;;  %v630_v43 = vld [vmem:[%s1229_s4] ss:$0 sm:$0xff] }
  0x6c   : > { %691 = vmatpush3.msra.mxu0 %v299_v10  ;;  %723 = vmatprep.subr.mxu1 %v404_v15 }
  0x6d   : > { %692 = vmatprep.subr.mxu0 %v298_v12  ;;  %724 = vmatpush3.msra.mxu1 %v404_v15 }
  0x6e   : > { %693 = vmatpush3.msra.mxu0 %v298_v12  ;;  %725 = vmatprep.subr.mxu1 %v403_v17 }
  0x6f   : > { %694 = vmatprep.subr.mxu0 %v297_v14  ;;  %726 = vmatpush3.msra.mxu1 %v403_v17 }
  0x70   : > { %695 = vmatpush3.msra.mxu0 %v297_v14  ;;  %727 = vmatprep.subr.mxu1 %v402_v19 }
  0x71   : > { %696 = vmatprep.subr.mxu0 %v296_v16  ;;  %728 = vmatpush3.msra.mxu1 %v402_v19 }
  0x72   : > { %697 = vmatpush3.msra.mxu0 %v296_v16  ;;  %729 = vmatprep.subr.mxu1 %v401_v21 }
  0x73   : > { %698 = vmatprep.subr.mxu0 %v295_v18  ;;  %730 = vmatpush3.msra.mxu1 %v401_v21 }
  0x74   : > { %699 = vmatpush3.msra.mxu0 %v295_v18  ;;  %731 = vmatprep.subr.mxu1 %v400_v23 }
  0x75   : > { %700 = vmatprep.subr.mxu0 %v294_v20  ;;  %732 = vmatpush3.msra.mxu1 %v400_v23 }
  0x76   : > { %701 = vmatpush3.msra.mxu0 %v294_v20  ;;  %733 = vmatprep.subr.mxu1 %v399_v25 }
  0x77   : > { %702 = vmatprep.subr.mxu0 %v293_v22  ;;  %734 = vmatpush3.msra.mxu1 %v399_v25 }
  0x78   : > { %703 = vmatpush3.msra.mxu0 %v293_v22  ;;  %735 = vmatprep.subr.mxu1 %v398_v27 }
  0x79   : > { %704 = vmatprep.subr.mxu0 %v292_v24  ;;  %736 = vmatpush3.msra.mxu1 %v398_v27 }
  0x7a   : > { %705 = vmatpush3.msra.mxu0 %v292_v24  ;;  %737 = vmatprep.subr.mxu1 %v397_v30 }
  0x7b   : > { %706 = vmatprep.subr.mxu0 %v291_v26  ;;  %738 = vmatpush3.msra.mxu1 %v397_v30 }
  0x7c   : > { %707 = vmatpush3.msra.mxu0 %v291_v26  ;;  %739 = vmatprep.subr.mxu1 %v396_v31 }
  0x7d   : > { %708 = vmatprep.subr.mxu0 %v290_v28  ;;  %740 = vmatpush3.msra.mxu1 %v396_v31 }
  0x7e   : > { %709 = vmatpush3.msra.mxu0 %v290_v28  ;;  %741 = vmatprep.subr.mxu1 %v395_v32 }
  0x7f   : > { %711 = vmatmul.mubr.f32.vlgmr.msra.gmra.mxu0 %v289_v29  ;;  %742 = vmatpush3.msra.mxu1 %v395_v32 }
  0x80   : > { %743 = vmatprep.subr.mxu1 %v394_v33 }
  0x81   : > { %744 = vmatpush3.msra.mxu1 %v394_v33 }
 0x13f   : > { %v712_v35 = vpop.f32.mrf.mxu0 }
 0x140   : > { %v385_v36 = vadd.f32 %v712_v35, %v629_v34 }
 0x141   : > { %v379_v37 = vpop.f32.mrf.mxu0 }
 0x142   : > { %v380_v38 = vadd.f32 %v629_v34, %v379_v37  ;;  %v391_v39 = vmul.f32 0.1, %v385_v36  ;;  %vm389_vm1 = vcmp.gt.f32.partialorder %v385_v36, 0.0 }
 0x144   : > { %vm388_vm0 = vcmp.gt.f32.partialorder %v380_v38, 0.0  ;;  %v390_v40 = vmul.f32 0.1, %v380_v38  ;;  %v393_v42 = vsel %vm389_vm1, %v385_v36, %v391_v39 }
 0x146   : > { %v392_v41 = vsel %vm388_vm0, %v380_v38, %v390_v40 }
 0x147   : > { %745 = vmatprep.mubr.f32.mxu1 %v392_v41 }
 0x148   : > { %746 = vmatmul.mubr.f32.vlgmr.msra.gmra.mxu1 %v393_v42 }
 0x208   : > { %v747_v44 = vpop.f32.mrf.mxu1 }
 0x209   : > { %v489_v45 = vadd.f32 %v747_v44, %v630_v43 }
 0x20a   : > { %v483_v46 = vpop.f32.mrf.mxu1 }
 0x20b   : > { %vm493_vm2 = vcmp.gt.f32.partialorder %v489_v45, 0.0  ;;  %v495_v47 = vmul.f32 0.1, %v489_v45  ;;  %v484_v48 = vadd.f32 %v630_v43, %v483_v46 }
 0x20c   : > { %507 = sbr.rel (!%p1242_p0) target bundleno = 556 (0x22c), region = 56 }
 0x20d   : > { %v497_v49 = vsel %vm493_vm2, %v489_v45, %v495_v47  ;;  %vm492_vm3 = vcmp.gt.f32.partialorder %v484_v48, 0.0  ;;  %v494_v50 = vmul.f32 0.1, %v484_v48 }
 0x20e   : > { %499 = vst [vmem:[%s277_s23 + $0x8] sm:$0xff] %v497_v49 }
 0x20f   : > { %v496_v51 = vsel %vm492_vm3, %v484_v48, %v494_v50 }
 0x210   : > { %498 = vst [vmem:[%s277_s23] sm:$0xff] %v496_v51 }
 0x211   : > { %s1251_s28 = smov (!%p510_p10, %s509_s28), 2 }
 0x212   : > { %s1169_s14 = sshll.u32 %s1251_s28, 7 }
 0x213   : > { %s514_s15 = ssub.s32 256, %s1169_s14 }
 0x214   : > { %515 = vsyncadd %s501_s25, %s514_s15  ;;  %p634_p1 = scmp.ne.s32.totalorder %s1169_s14, 0  ;;  %s641_s26 = sshll.u32 %s1023_s22, 8 }
 0x215   : > { %s1179_s11 = scalar_lea.hbm %s1230_s5, %s641_s26  ;;  %s520_s13 = sshll.u32 %s277_s23, 4  ;;  %s1181_s13 = int_to_ptr.vmem [resolvable:$true] %s520_s13 }
 0x216   : > { %s892_s10 = scalar_lea.vmem %s1181_s13, %s1169_s14  ;;  %s969_s29 = smov [#allocation8]  }
 0x217   : > { %p893_p3 = scmp.ne.s32.totalorder %s1181_s13, %s892_s10  ;;  %s896_s7 = sshll.u32 %s969_s29, 4  ;;  %s897_s7 = int_to_ptr.vmem [resolvable:$false] %s896_s7 }
 0x218   : > { %s898_s22 = scalar_lea.vmem %s897_s7, 512  ;;  %p899_p12 = scmp.lt.s32.totalorder %s1181_s13, %s897_s7 }
 0x219   : > { %p894_p7 = pnand %p893_p3, %p634_p1  ;;  %p900_p8 = scmp.lt.s32.totalorder %s898_s22, %s892_s10 }
 0x21b   : > { %p895_p9 = pneg %p894_p7  ;;  %p901_p4 = por %p900_p8, %p899_p12 }
 0x21d   : > { %p902_p6 = pnand %p901_p4, %p895_p9 }
 0x21f   : > { %905 = shalt.err (!%p902_p6)
}
 0x220   : > { %s906_s16 = scalar_lea.hbm %s1179_s11, %s1169_s14  ;;  %s910_s12 = scalar_lea.hbm %s1230_s5, 896 }
 0x221   : > { %p907_p11 = scmp.ne.s32.totalorder %s1179_s11, %s906_s16  ;;  %p911_p13 = scmp.lt.s32.totalorder %s1179_s11, %s1230_s5 }
 0x222   : > { %p912_p0 = scmp.lt.s32.totalorder %s910_s12, %s906_s16 }
 0x223   : > { %p908_p2 = pnand %p907_p11, %p634_p1 }
 0x224   : > { %p913_p10 = por %p912_p0, %p911_p13 }
 0x225   : > { %p909_p5 = pneg %p908_p2 }
 0x227   : > { %p914_p3 = pnand %p913_p10, %p909_p5 }
 0x229   : > { %917 = shalt.err (!%p914_p3)
}
 0x22a   : > { %s970_s26 = smov 128   ;;  %s971_s30 = smov 8  }
 0x22b   : > { %526 = dma.vmem_to_hbm [thread:$0]  (%p634_p1), %s1181_s13, %s1169_s14, %s1179_s11, %s501_s25, %s970_s26, %s970_s26, %s971_s30  }
 0x22c PF: > { %p773_p7 = scmp.ge.s32.totalorder %s960_s21, 2  ;;  %s535_s8 = sand.u32 1, %s948_s18  }
 0x22d   : > { %p1243_p9 = scmp.ne.s32.totalorder %s1236_s6, 0  ;;  %s536_s10 = scalar_lea.sflag [#allocation4], %s535_s8 }
 0x22f   : > { %p766_p12 = pnand %p773_p7, %p1243_p9 }
 0x231   : > { %p767_p8 = pneg %p766_p12 }
 0x233   : > { %943 = dma.done.wait (%p767_p8), %s536_s10, 256  }
 0x234   : > { %945 = vsyncadd (%p767_p8), %s536_s10, 4294967040  ;;  %p19_p4 = scmp.ge.s32.totalorder %s1027_s24, 6   ;;  %s1244_s18 = smov %s952_s19 }
 0x235   : > { %s1245_s19 = smov %s956_s20  ;;  %s1246_s20 = smov %s1039_s27 }
 0x236   : > { %s1247_s21 = smov %s1027_s24  ;;  %21 = sbr.rel (!%p19_p4) target bundleno = 6 (0x6), region = 93 }
 0x23b   :  { %541 = vsyncpa [#allocation3], 1 }
 0x23c   :  { %543 = vsyncpa [#allocation3 + $0x1], 1 }
 0x23d   :  { %544 = vsyncpa [#allocation6], 1 }
 0x23e   :  { %545 = vsyncpa [#allocation4], 1 }
 0x23f   :  { %547 = vsyncpa [#allocation4 + $0x1], 1 }

</bundles_post_ra>
